<compile_context>
chip_gen: v6e
topology: v6e:2x2x1
jax: 0.10.0
libtpu: 0.0.40
codegen_flags: <defaults>
</compile_context>

<pallas_src>
import jax
import jax.numpy as jnp
from jax.experimental import pallas as pl
from jax.experimental.pallas import tpu as pltpu


def _round_up(x, m):
    return ((x + m - 1) // m) * m


def _vmem_capacity_bytes():
    """Physical VMEM per TensorCore; conservative fallback if the query fails."""
    try:
        cap = int(pltpu.get_tpu_info().vmem_capacity_bytes)
        if cap > 0:
            return cap
    except Exception:
        pass
    return 64 * 1024 * 1024  # v7x per-core size == safe lower bound everywhere


class FFNParams:
    """Weights pre-padded to lane/tile-friendly shapes and pre-cast to bf16.

    Built once at init so the per-call wrapper does no weight re-padding or
    re-casting (no extra full-W1/W2 HBM round trip per forward).
    """

    def __init__(self, w1p, b1p, w2p, b2p, n_embd, hidden, th):
        self.w1p, self.b1p, self.w2p, self.b2p = w1p, b1p, w2p, b2p
        self.n_embd, self.hidden, self.th = n_embd, hidden, th


def prepare_ffn_params(w1, b1, w2, b2, *, th=1024):
    """Pad/cast weights once.  Zero-padded W1 cols / b1 / W2 rows contribute 0."""
    C, H = w1.shape
    Cp = _round_up(C, 128)
    # Hidden tile: requested th (128-multiple), capped at the 128-rounded hidden
    # size; H is padded UP to a multiple of th (no gcd shrinking of th).
    th = max(128, min(_round_up(th, 128), _round_up(H, 128)))
    Hp = _round_up(H, th)
    w1p = jnp.zeros((Cp, Hp), jnp.bfloat16).at[:C, :H].set(w1.astype(jnp.bfloat16))
    w2p = jnp.zeros((Hp, Cp), jnp.bfloat16).at[:H, :C].set(w2.astype(jnp.bfloat16))
    b1p = jnp.zeros((1, Hp), jnp.float32).at[0, :H].set(b1.astype(jnp.float32))
    b2p = jnp.zeros((1, Cp), jnp.float32).at[0, :C].set(b2.astype(jnp.float32))
    return FFNParams(w1p, b1p, w2p, b2p, C, H, th)


def ffn_kernel(x_ref, w1_ref, b1_ref, w2_ref, b2_ref, o_ref, acc_ref):
    # x_ref : (tm, Cp)  bf16      w1_ref: (Cp, th) bf16    b1_ref: (1, th) f32
    # w2_ref: (th, Cp)  bf16      b2_ref: (1, Cp)  f32
    # o_ref : (tm, Cp)  out dtype acc_ref: (tm, Cp) f32 VMEM scratch
    k = pl.program_id(1)

    @pl.when(k == 0)
    def _():
        acc_ref[...] = jnp.zeros_like(acc_ref)

    # (tm, th) slab of hidden activations; MXU with f32 accumulation.
    h = jnp.dot(x_ref[...], w1_ref[...], preferred_element_type=jnp.float32)
    h = jnp.maximum(h + b1_ref[...], 0.0)            # bias + ReLU in f32

    # Contract the slab against W2; accumulate in the f32 scratch.
    # (h is rounded to bf16 here — documented extra quantization step.)
    acc_ref[...] += jnp.dot(h.astype(w2_ref.dtype), w2_ref[...],
                            preferred_element_type=jnp.float32)

    @pl.when(k == pl.num_programs(1) - 1)
    def _():
        o_ref[...] = (acc_ref[...] + b2_ref[...]).astype(o_ref.dtype)


def _pick_tm(M):
    """Row tile from {512,256,128}: minimize padded waste, prefer >=2 row tiles
    so the 'parallel' axis can use both v7x TensorCores."""
    if M <= 128:
        return max(8, _round_up(M, 8))
    best_key, best_tm = None, 128
    for c in (512, 256, 128):
        mp = _round_up(M, c)
        key = (mp // c < 2, mp - M, -c)   # (fewer than 2 tiles?, waste, prefer big)
        if best_key is None or key < best_key:
            best_key, best_tm = key, c
    return best_tm


def _vmem_footprint(tm, th, Cp, out_bytes, wbuf):
    bf16, f32 = 2, 4
    return (2 * tm * Cp * bf16          # x block (double buffered)
            + wbuf * Cp * th * bf16     # W1 slab
            + wbuf * th * Cp * bf16     # W2 slab
            + 2 * (th + Cp) * f32       # biases
            + 2 * tm * Cp * out_bytes   # output block
            + tm * Cp * f32             # f32 accumulator scratch
            + tm * th * f32)            # f32 hidden slab (live intermediate)


def feed_forward(x, params, *, out_dtype=None, tm=512):
    """(B, T, C) -> (B, T, C): Linear(C->4C) -> ReLU -> Linear(4C->C) -> Dropout.

    Dropout is the eval-mode identity (deterministic forward).  Pass
    out_dtype=jnp.bfloat16 if downstream allows, to halve output writeback.
    """
    B, T, C = x.shape
    assert C == params.n_embd, (C, params.n_embd)
    out_dtype = jnp.dtype(out_dtype if out_dtype is not None else x.dtype)
    Cp, Hp = params.w1p.shape
    th = params.th
    M = B * T

    # ---- tile selection / VMEM budgeting ------------------------------------
    tm = min(tm, _pick_tm(M))
    k_steps = Hp // th
    vmem_cap = _vmem_capacity_bytes()
    budget = int(vmem_cap * 0.75)                 # headroom for compiler scratch
    # Deeper weight pipelining when weight-DMA-bound (few row tiles, many slabs).
    wbuf = 3 if (_round_up(M, tm) // tm <= 2 and k_steps >= 3) else 2
    out_bytes = out_dtype.itemsize
    while _vmem_footprint(tm, th, Cp, out_bytes, wbuf) > budget:
        if tm > 128:
            tm = max(128, tm // 2)
        elif th > 128 and th % 256 == 0:          # keep th a 128-mult divisor of Hp
            th //= 2
        else:
            break
    Mp = _round_up(M, tm)
    grid = (Mp // tm, Hp // th)

    # ---- activations: cast to bf16; pad only if actually needed -------------
    x2 = x.reshape(M, C).astype(jnp.bfloat16)
    if Mp != M or Cp != C:
        x2 = jnp.pad(x2, ((0, Mp - M), (0, Cp - C)))

    # ---- specs ---------------------------------------------------------------
    if wbuf == 3:
        w1_spec = pl.BlockSpec((Cp, th), lambda i, k: (0, k),
                               pipeline_mode=pl.Buffered(3))
        w2_spec = pl.BlockSpec((th, Cp), lambda i, k: (k, 0),
                               pipeline_mode=pl.Buffered(3))
    else:
        w1_spec = pl.BlockSpec((Cp, th), lambda i, k: (0, k))
        w2_spec = pl.BlockSpec((th, Cp), lambda i, k: (k, 0))

    fp = _vmem_footprint(tm, th, Cp, out_bytes, wbuf)
    vmem_limit = int(min(max(1.3 * fp + (2 << 20), 32 << 20), 0.9 * vmem_cap))

    cost = pl.CostEstimate(
        flops=4 * Mp * Cp * Hp,                   # two matmuls, 2 flops/MAC
        transcendentals=0,
        bytes_accessed=(x2.size * 2
                        + params.w1p.size * 2 + params.w2p.size * 2
                        + (params.b1p.size + params.b2p.size) * 4
                        + Mp * Cp * out_bytes))

    out2 = pl.pallas_call(
        ffn_kernel,
        out_shape=jax.ShapeDtypeStruct((Mp, Cp), out_dtype),
        grid_spec=pltpu.PrefetchScalarGridSpec(
            num_scalar_prefetch=0,
            grid=grid,
            in_specs=[
                pl.BlockSpec((tm, Cp), lambda i, k: (i, 0)),   # x rows (const over k)
                w1_spec,                                       # W1 hidden slab
                pl.BlockSpec((1, th), lambda i, k: (0, k)),    # b1 slab
                w2_spec,                                       # W2 hidden slab
                pl.BlockSpec((1, Cp), lambda i, k: (0, 0)),    # b2 (grid-invariant)
            ],
            out_specs=pl.BlockSpec((tm, Cp), lambda i, k: (i, 0)),
            scratch_shapes=[pltpu.VMEM((tm, Cp), jnp.float32)],
        ),
        compiler_params=pltpu.CompilerParams(
            dimension_semantics=("parallel", "arbitrary"),
            vmem_limit_bytes=vmem_limit,
        ),
        cost_estimate=cost,
    )(x2, params.w1p, params.b1p, params.w2p, params.b2p)

    return out2[:M, :C].reshape(B, T, C)


def init_params(key, n_embd):
    """Deterministic init mimicking nn.Linear's uniform(-1/sqrt(fan_in), ...)."""
    h = 4 * n_embd
    k1, k2, k3, k4 = jax.random.split(key, 4)
    bound1 = 1.0 / (n_embd ** 0.5)
    bound2 = 1.0 / (h ** 0.5)
    # Stored transposed vs. PyTorch (in_features, out_features) for y = x @ W.
    w1 = jax.random.uniform(k1, (n_embd, h), jnp.float32, -bound1, bound1)
    b1 = jax.random.uniform(k2, (h,), jnp.float32, -bound1, bound1)
    w2 = jax.random.uniform(k3, (h, n_embd), jnp.float32, -bound2, bound2)
    b2 = jax.random.uniform(k4, (n_embd,), jnp.float32, -bound2, bound2)
    return w1, b1, w2, b2


if __name__ == "__main__":
    def ref_ffn(x, w1, b1, w2, b2):
        return jnp.maximum(x @ w1 + b1, 0.0) @ w2 + b2

    key = jax.random.PRNGKey(0)

    # 1) Small shape implied by the module: batch=2, seq=8, n_embd=32.
    B, T, n_embd = 2, 8, 32
    kx, kp, key = jax.random.split(key, 3)
    x = jax.random.normal(kx, (B, T, n_embd), jnp.float32)
    w1, b1, w2, b2 = init_params(kp, n_embd)
    params = prepare_ffn_params(w1, b1, w2, b2)        # once, at init
    out = jax.block_until_ready(feed_forward(x, params))
    ref = ref_ffn(x, w1, b1, w2, b2)
    assert out.shape == (B, T, n_embd)
    assert jnp.allclose(out, ref, atol=5e-2, rtol=5e-2), float(
        jnp.max(jnp.abs(out - ref)))

    # 2) Shape exercising multi-tile grid, row/lane/hidden padding and the f32
    #    accumulator across k steps (n_embd=192 -> H=768, th=512 -> 2 k-steps).
    B2, T2, n_embd2 = 2, 136, 192
    kx2, kp2 = jax.random.split(key)
    xb = jax.random.normal(kx2, (B2, T2, n_embd2), jnp.float32)
    w1b, b1b, w2b, b2b = init_params(kp2, n_embd2)
    params2 = prepare_ffn_params(w1b, b1b, w2b, b2b, th=512)
    out2 = jax.block_until_ready(feed_forward(xb, params2))
    ref2 = ref_ffn(xb, w1b, b1b, w2b, b2b)
    assert out2.shape == (B2, T2, n_embd2)
    assert jnp.allclose(out2, ref2, atol=5e-2, rtol=5e-2), float(
        jnp.max(jnp.abs(out2 - ref2)))

    print("KERNEL_OK")
</pallas_src>

<mosaic_0001>
module attributes {stable_mosaic.version = 11 : i64} {
  func.func @ffn_kernel(%arg0: i32, %arg1: i32, %arg2: memref<16x128xbf16, #tpu.memory_space<vmem>>, %arg3: memref<128x128xbf16, #tpu.memory_space<vmem>>, %arg4: memref<1x128xf32, #tpu.memory_space<vmem>>, %arg5: memref<128x128xbf16, #tpu.memory_space<vmem>>, %arg6: memref<1x128xf32, #tpu.memory_space<vmem>>, %arg7: memref<16x128xf32, #tpu.memory_space<vmem>>, %arg8: memref<16x128xf32, #tpu.memory_space<vmem>>) attributes {dimension_semantics = [#tpu.dimension_semantics<parallel>, #tpu.dimension_semantics<arbitrary>], iteration_bounds = array<i64: 1, 1>, scalar_prefetch = 0 : i64, scratch_operands = 1 : i64, tpu.core_type = #tpu.core_type<tc>, window_params = [{transform_indices = @transform_0, window_bounds = array<i64: 16, 128>}, {transform_indices = @transform_1, window_bounds = array<i64: 128, 128>}, {transform_indices = @transform_2, window_bounds = array<i64: 1, 128>}, {transform_indices = @transform_3, window_bounds = array<i64: 128, 128>}, {pipeline_mode = #tpu.pipeline_mode<synchronous>, transform_indices = @transform_4, window_bounds = array<i64: 1, 128>}, {transform_indices = @transform_5, window_bounds = array<i64: 16, 128>}]} {
    %c0_i32 = arith.constant 0 : i32
    %0 = arith.cmpi eq, %arg1, %c0_i32 : i32
    %1 = arith.extui %0 : i1 to i32
    %c0_i32_0 = arith.constant 0 : i32
    %2 = arith.cmpi ne, %1, %c0_i32_0 : i32
    scf.if %2 {
      %cst_16 = arith.constant 0.000000e+00 : f32
      %20 = vector.broadcast %cst_16 : f32 to vector<16x128xf32>
      %c0_17 = arith.constant 0 : index
      %c0_18 = arith.constant 0 : index
      %21 = vector.load %arg8[%c0_17, %c0_18] : memref<16x128xf32, #tpu.memory_space<vmem>>, vector<16x128xf32>
      tpu.vector_store %arg8[%c0_17, %c0_18], %20 {strides = array<i32>} : memref<16x128xf32, #tpu.memory_space<vmem>>, vector<16x128xf32>,
    } else {
    }
    %c0 = arith.constant 0 : index
    %c0_1 = arith.constant 0 : index
    %3 = vector.load %arg2[%c0, %c0_1] : memref<16x128xbf16, #tpu.memory_space<vmem>>, vector<16x128xbf16>
    %c0_2 = arith.constant 0 : index
    %c0_3 = arith.constant 0 : index
    %4 = vector.load %arg3[%c0_2, %c0_3] : memref<128x128xbf16, #tpu.memory_space<vmem>>, vector<128x128xbf16>
    %cst = arith.constant dense<0.000000e+00> : vector<16x128xf32>
    %5 = tpu.matmul %3, %4, %cst {dimension_numbers = #tpu.dot_dimension_numbers<[1], [0], [0], [1], [0, 0, 1, 1], [], []>} : vector<16x128xbf16>, vector<128x128xbf16>, vector<16x128xf32> -> vector<16x128xf32>
    %c0_4 = arith.constant 0 : index
    %c0_5 = arith.constant 0 : index
    %6 = vector.load %arg4[%c0_4, %c0_5] : memref<1x128xf32, #tpu.memory_space<vmem>>, vector<1x128xf32>
    %7 = vector.broadcast %6 : vector<1x128xf32> to vector<16x128xf32>
    %8 = arith.addf %5, %7 : vector<16x128xf32>
    %cst_6 = arith.constant 0.000000e+00 : f32
    %9 = vector.broadcast %cst_6 : f32 to vector<16x128xf32>
    %10 = arith.maximumf %8, %9 : vector<16x128xf32>
    %c0_7 = arith.constant 0 : index
    %c0_8 = arith.constant 0 : index
    %11 = vector.load %arg8[%c0_7, %c0_8] : memref<16x128xf32, #tpu.memory_space<vmem>>, vector<16x128xf32>
    %12 = arith.truncf %10 : vector<16x128xf32> to vector<16x128xbf16>
    %c0_9 = arith.constant 0 : index
    %c0_10 = arith.constant 0 : index
    %13 = vector.load %arg5[%c0_9, %c0_10] : memref<128x128xbf16, #tpu.memory_space<vmem>>, vector<128x128xbf16>
    %cst_11 = arith.constant dense<0.000000e+00> : vector<16x128xf32>
    %14 = tpu.matmul %12, %13, %cst_11 {dimension_numbers = #tpu.dot_dimension_numbers<[1], [0], [0], [1], [0, 0, 1, 1], [], []>} : vector<16x128xbf16>, vector<128x128xbf16>, vector<16x128xf32> -> vector<16x128xf32>
    %15 = arith.addf %11, %14 : vector<16x128xf32>
    %c0_12 = arith.constant 0 : index
    %c0_13 = arith.constant 0 : index
    %16 = vector.load %arg8[%c0_12, %c0_13] : memref<16x128xf32, #tpu.memory_space<vmem>>, vector<16x128xf32>
    tpu.vector_store %arg8[%c0_12, %c0_13], %15 {strides = array<i32>} : memref<16x128xf32, #tpu.memory_space<vmem>>, vector<16x128xf32>,
    %c0_i32_14 = arith.constant 0 : i32
    %17 = arith.cmpi eq, %arg1, %c0_i32_14 : i32
    %18 = arith.extui %17 : i1 to i32
    %c0_i32_15 = arith.constant 0 : i32
    %19 = arith.cmpi ne, %18, %c0_i32_15 : i32
    scf.if %19 {
      %c0_16 = arith.constant 0 : index
      %c0_17 = arith.constant 0 : index
      %20 = vector.load %arg8[%c0_16, %c0_17] : memref<16x128xf32, #tpu.memory_space<vmem>>, vector<16x128xf32>
      %c0_18 = arith.constant 0 : index
      %c0_19 = arith.constant 0 : index
      %21 = vector.load %arg6[%c0_18, %c0_19] : memref<1x128xf32, #tpu.memory_space<vmem>>, vector<1x128xf32>
      %22 = vector.broadcast %21 : vector<1x128xf32> to vector<16x128xf32>
      %23 = arith.addf %20, %22 : vector<16x128xf32>
      %c0_20 = arith.constant 0 : index
      %c0_21 = arith.constant 0 : index
      %24 = vector.load %arg7[%c0_20, %c0_21] : memref<16x128xf32, #tpu.memory_space<vmem>>, vector<16x128xf32>
      tpu.vector_store %arg7[%c0_20, %c0_21], %23 {strides = array<i32>} : memref<16x128xf32, #tpu.memory_space<vmem>>, vector<16x128xf32>,
    } else {
    }
    return
  }
  func.func @transform_0(%arg0: i32, %arg1: i32) -> (i32, i32) {
    %c0_i32 = arith.constant 0 : i32
    %c0_i32_0 = arith.constant 0 : i32
    return %arg0, %c0_i32 : i32, i32
  }
  func.func @transform_1(%arg0: i32, %arg1: i32) -> (i32, i32) {
    %c0_i32 = arith.constant 0 : i32
    %c0_i32_0 = arith.constant 0 : i32
    return %c0_i32, %arg1 : i32, i32
  }
  func.func @transform_2(%arg0: i32, %arg1: i32) -> (i32, i32) {
    %c0_i32 = arith.constant 0 : i32
    %c0_i32_0 = arith.constant 0 : i32
    return %c0_i32, %arg1 : i32, i32
  }
  func.func @transform_3(%arg0: i32, %arg1: i32) -> (i32, i32) {
    %c0_i32 = arith.constant 0 : i32
    %c0_i32_0 = arith.constant 0 : i32
    return %arg1, %c0_i32 : i32, i32
  }
  func.func @transform_4(%arg0: i32, %arg1: i32) -> (i32, i32) {
    %c0_i32 = arith.constant 0 : i32
    %c0_i32_0 = arith.constant 0 : i32
    %c0_i32_1 = arith.constant 0 : i32
    return %c0_i32, %c0_i32_0 : i32, i32
  }
  func.func @transform_5(%arg0: i32, %arg1: i32) -> (i32, i32) {
    %c0_i32 = arith.constant 0 : i32
    %c0_i32_0 = arith.constant 0 : i32
    return %arg0, %c0_i32 : i32, i32
  }
}

</mosaic_0001>

<bundles_post_ra>
// kernel: tpu_custom_call.1
= control target key start
LH: loop header
LB: loop body
LE: loop exit
PB: predicated region body
PF: predicated region fallthrough
CT: control target
= control target key end

     0   :  { %10 = vsyncpa [#allocation4], 0  ;;  %s585_s0 = inlined_call_operand.hbm [shape: bf16[16,128], index: 0, kind: input, shape index: {}]   ;;  %s586_s1 = inlined_call_operand.hbm [shape: bf16[128,128], index: 1, kind: input, shape index: {}]   ;;  %s587_s2 = inlined_call_operand.vmem [shape: f32[1,128], index: 2, kind: input, shape index: {}]   ;;  %s588_s3 = inlined_call_operand.hbm [shape: bf16[128,128], index: 3, kind: input, shape index: {}]   ;;  %s589_s4 = inlined_call_operand.vmem [shape: f32[1,128], index: 4, kind: input, shape index: {}]   ;;  %s590_s5 = inlined_call_operand.hbm [shape: f32[16,128], index: 5, kind: output, shape index: {}]  }
   0x1   :  { %11 = vsyncpa [#allocation7], 0 }
   0x2   :  { %12 = vsyncpa [#allocation5], 0  ;;  %s527_s18 = smov [#allocation6]   ;;  %s528_s20 = smov [#allocation3]  }
   0x3   :  { %s30_s19 = sshll.u32 %s527_s18, 4  ;;  %s18_s21 = sshll.u32 %s528_s20, 4  ;;  %s31_s19 = int_to_ptr.vmem [resolvable:$true] %s30_s19  ;;  %s19_s21 = int_to_ptr.vmem [resolvable:$true] %s18_s21 }
   0x4   :  { %s449_s22 = scalar_lea.vmem %s31_s19, 1024  ;;  %p454_p1 = scmp.lt.s32.totalorder %s31_s19, %s31_s19 }
   0x5   :  { %p450_p0 = scmp.ne.s32.totalorder %s31_s19, %s449_s22  ;;  %p455_p2 = scmp.lt.s32.totalorder %s449_s22, %s449_s22 }
   0x7   :  { %p456_p3 = por %p455_p2, %p454_p1 }
   0x9   :  { %p457_p4 = pnand %p456_p3, %p450_p0 }
   0xb   :  { %460 = shalt.err (!%p457_p4)
}
   0xc   :  { %s529_s23 = smov 64   ;;  %s530_s24 = smov 4  }
   0xd   :  { %36 = dma.hbm_to_vmem [thread:$0]  %s586_s1, 1024, %s31_s19, [#allocation7], %s529_s23, %s529_s23, %s530_s24  }
   0xe   :  { %s469_s27 = scalar_lea.vmem %s19_s21, 128  ;;  %p474_p6 = scmp.lt.s32.totalorder %s19_s21, %s19_s21 }
   0xf   :  { %p470_p5 = scmp.ne.s32.totalorder %s19_s21, %s469_s27  ;;  %p475_p7 = scmp.lt.s32.totalorder %s469_s27, %s469_s27 }
  0x11   :  { %p476_p8 = por %p475_p7, %p474_p6 }
  0x13   :  { %p477_p9 = pnand %p476_p8, %p470_p5 }
  0x15   :  { %480 = shalt.err (!%p477_p9)
}
  0x16   :  { %24 = dma.hbm_to_vmem [thread:$0]  %s585_s0, 128, %s19_s21, [#allocation4], %s529_s23, %s529_s23, %s530_s24  }
  0x17   :  { %s531_s30 = smov [#allocation8]  }
  0x18   :  { %s44_s6 = sshll.u32 %s531_s30, 4  ;;  %s45_s6 = int_to_ptr.vmem [resolvable:$true] %s44_s6 }
  0x19   :  { %s489_s7 = scalar_lea.vmem %s45_s6, 1024  ;;  %p494_p11 = scmp.lt.s32.totalorder %s45_s6, %s45_s6 }
  0x1a   :  { %p490_p10 = scmp.ne.s32.totalorder %s45_s6, %s489_s7  ;;  %p495_p12 = scmp.lt.s32.totalorder %s489_s7, %s489_s7 }
  0x1c   :  { %p496_p13 = por %p495_p12, %p494_p11 }
  0x1e   :  { %p497_p0 = pnand %p496_p13, %p490_p10 }
  0x20   :  { %500 = shalt.err (!%p497_p0)
}
  0x21   :  { %50 = dma.hbm_to_vmem [thread:$0]  %s588_s3, 1024, %s45_s6, [#allocation7], %s529_s23, %s529_s23, %s530_s24  }
  0x22   :  { %521 = dma.done.wait [#allocation4], 128  }
  0x23   :  { %522 = vsyncadd [#allocation4], 4294967168 }
  0x24   :  { %523 = dma.done.wait [#allocation7], 2048  }
  0x25   :  { %524 = vsyncadd [#allocation7], 4294965248  ;;  %v532_v0 = vmov 0.0   ;;  %vm533_vm0 = vmmov 0   ;;  %v424_v1 = vld [vmem:[#allocation6 + $0x38] sm:$0xff]   ;;  %v425_v2 = vld [vmem:[#allocation6 + $0x30] sm:$0xff]  }
  0x26   :  { %374 = vmatprep.subr.bf16.mxu0 %v532_v0  ;;  %390 = vmatprep.mubr.msk.bf16.mxu0 %vm533_vm0, %v532_v0  ;;  %v426_v3 = vld [vmem:[#allocation6 + $0x28] sm:$0xff]   ;;  %v433_v4 = vld [vmem:[#allocation8 + $0x38] sm:$0xff]   ;;  %v427_v5 = vld [vmem:[#allocation6 + $0x20] sm:$0xff]   ;;  %s534_s11 = smov [#allocation9]  }
  0x27   :  { %394 = vmatprep.subr.bf16.mxu1 %v532_v0  ;;  %410 = vmatprep.mubr.msk.bf16.mxu1 %vm533_vm0, %v532_v0  ;;  %v434_v6 = vld [vmem:[#allocation8 + $0x30] sm:$0xff]   ;;  %v428_v7 = vld [vmem:[#allocation6 + $0x18] sm:$0xff]   ;;  %v435_v8 = vld [vmem:[#allocation8 + $0x28] sm:$0xff]   ;;  %s324_s12 = sshll.u32 %s534_s11, 4  ;;  %s325_s12 = int_to_ptr.vmem [resolvable:$true] %s324_s12 }
  0x28   :  { %375 = vmatpush3.bf16.msra.mxu0 %v424_v1  ;;  %395 = vmatpush3.bf16.msra.mxu1 %v433_v4  ;;  %v429_v9 = vld [vmem:[#allocation6 + $0x10] sm:$0xff]   ;;  %v436_v10 = vld [vmem:[#allocation8 + $0x20] sm:$0xff]   ;;  %v430_v11 = vld [vmem:[#allocation6 + $0x8] sm:$0xff]   ;;  %p506_p2 = scmp.lt.s32.totalorder %s325_s12, %s325_s12 }
  0x29   :  { %376 = vmatprep.subr.bf16.mxu0 %v532_v0  ;;  %396 = vmatprep.subr.bf16.mxu1 %v532_v0  ;;  %v437_v12 = vld [vmem:[#allocation8 + $0x18] sm:$0xff]   ;;  %v431_v13 = vld [vmem:[#allocation6] sm:$0xff]   ;;  %v438_v15 = vld [vmem:[#allocation8 + $0x10] sm:$0xff]  }
  0x2a   :  { %v432_v14 = vld [vmem:[#allocation3] sm:$0xff]   ;;  %v439_v16 = vld [vmem:[#allocation8 + $0x8] sm:$0xff]   ;;  %v440_v17 = vld [vmem:[#allocation8] sm:$0xff]  }
  0x2b   :  { %v337_v18 = vld [vmem:[%s587_s2] ss:$0 sm:$0xff]  ;;  %s501_s2 = scalar_lea.vmem %s325_s12, 256 }
  0x2c   :  { %377 = vmatpush3.bf16.msra.mxu0 %v425_v2  ;;  %397 = vmatpush3.bf16.msra.mxu1 %v434_v6  ;;  %v355_v28 = vld [vmem:[%s589_s4] ss:$0 sm:$0xff]  ;;  %p502_p1 = scmp.ne.s32.totalorder %s325_s12, %s501_s2  ;;  %p507_p3 = scmp.lt.s32.totalorder %s501_s2, %s501_s2 }
  0x2d   :  { %378 = vmatprep.subr.bf16.mxu0 %v532_v0  ;;  %398 = vmatprep.subr.bf16.mxu1 %v532_v0 }
  0x2e   :  { %p508_p4 = por %p507_p3, %p506_p2 }
  0x30   :  { %379 = vmatpush3.bf16.msra.mxu0 %v426_v3  ;;  %399 = vmatpush3.bf16.msra.mxu1 %v435_v8  ;;  %p509_p5 = pnand %p508_p4, %p502_p1 }
  0x31   :  { %380 = vmatprep.subr.bf16.mxu0 %v532_v0  ;;  %400 = vmatprep.subr.bf16.mxu1 %v532_v0 }
  0x34   :  { %381 = vmatpush3.bf16.msra.mxu0 %v427_v5  ;;  %401 = vmatpush3.bf16.msra.mxu1 %v436_v10 }
  0x35   :  { %382 = vmatprep.subr.bf16.mxu0 %v532_v0  ;;  %402 = vmatprep.subr.bf16.mxu1 %v532_v0 }
  0x38   :  { %383 = vmatpush3.bf16.msra.mxu0 %v428_v7  ;;  %403 = vmatpush3.bf16.msra.mxu1 %v437_v12 }
  0x39   :  { %384 = vmatprep.subr.bf16.mxu0 %v532_v0  ;;  %404 = vmatprep.subr.bf16.mxu1 %v532_v0 }
  0x3c   :  { %385 = vmatpush3.bf16.msra.mxu0 %v429_v9  ;;  %405 = vmatpush3.bf16.msra.mxu1 %v438_v15 }
  0x3d   :  { %386 = vmatprep.subr.bf16.mxu0 %v532_v0  ;;  %406 = vmatprep.subr.bf16.mxu1 %v532_v0 }
  0x40   :  { %387 = vmatpush3.bf16.msra.mxu0 %v430_v11  ;;  %407 = vmatpush3.bf16.msra.mxu1 %v439_v16 }
  0x41   :  { %388 = vmatprep.subr.bf16.mxu0 %v532_v0  ;;  %408 = vmatprep.subr.bf16.mxu1 %v532_v0 }
  0x44   :  { %389 = vmatpush3.bf16.msra.mxu0 %v431_v13  ;;  %409 = vmatpush3.bf16.msra.mxu1 %v440_v17 }
  0x47   :  { %391 = vmatmul.mubr.bf16.vlgmr.msra.gmra.mxu0 %v432_v14 }
 0x107   :  { %v182_v19 = vpop.f32.mrf.mxu0 }
 0x108   :  { %v183_v21 = vadd.f32 %v337_v18, %v182_v19 }
 0x109   :  { %v392_v20 = vpop.f32.mrf.mxu0 }
 0x10a   :  { %v189_v25 = vmax.f32 %v183_v21, 0.0 }
 0x10b   :  { %v185_v22 = vpop.f32.mrf.mxu0 }
 0x10c   :  { %v186_v23 = vadd.f32 %v337_v18, %v185_v22 }
 0x10d   :  { %v393_v24 = vpop.f32.mrf.mxu0 }
 0x10e   :  { %v190_v26 = vmax.f32 %v186_v23, 0.0 }
 0x110   :  { %v193_v27 = vpack.c.bf16 %v190_v26, %v189_v25 }
 0x112   :  { %411 = vmatmul.mubr.bf16.vlgmr.msra.gmra.mxu1 %v193_v27 }
 0x1d2   :  { %v292_v29 = vpop.f32.mrf.mxu1 }
 0x1d3   :  { %v315_v30 = vadd.f32 %v355_v28, %v292_v29 }
 0x1d4   :  { %v412_v31 = vpop.f32.mrf.mxu1 }
 0x1d5   :  { %317 = vst [vmem:[#allocation9] sm:$0xff] %v315_v30 }
 0x1d6   :  { %v295_v32 = vpop.f32.mrf.mxu1 }
 0x1d7   :  { %v316_v33 = vadd.f32 %v355_v28, %v295_v32 }
 0x1d8   :  { %v413_v34 = vpop.f32.mrf.mxu1 }
 0x1d9   :  { %318 = vst [vmem:[#allocation9 + $0x8] sm:$0xff] %v316_v33 }
 0x1da   :  { %512 = shalt.err (!%p509_p5)
}
 0x1db   :  { %s535_s13 = smov 128   ;;  %s536_s4 = smov 8  }
 0x1dc   :  { %330 = dma.vmem_to_hbm [thread:$0]  %s325_s12, 256, %s590_s5, [#allocation5], %s535_s13, %s535_s13, %s536_s4  }
 0x1dd   :  { %525 = dma.done.wait [#allocation5], 256  }
 0x1de   :  { %526 = vsyncadd [#allocation5], 4294967040 }
 0x1df   :  { %334 = vsyncpa [#allocation4], 1 }
 0x1e0   :  { %335 = vsyncpa [#allocation7], 1 }
 0x1e1   :  { %336 = vsyncpa [#allocation5], 1 }

</bundles_post_ra>
